<compile_context>
chip_gen: v7x
topology: tpu7x:2x2x1
jax: 0.10.0
libtpu: 0.0.40
codegen_flags: <defaults>
</compile_context>

<pallas_src>
import functools

import jax
import jax.numpy as jnp
from jax.experimental import pallas as pl
from jax.experimental.pallas import tpu as pltpu


# ---------------------------------------------------------------------------
# pltpu.roll convention probe (runs once, eagerly, outside any jit trace).
# ---------------------------------------------------------------------------
_ROLL_MATCHES_NUMPY = None


def _probe_roll_convention():
    """True iff pltpu.roll follows jnp.roll semantics (out[i] = in[i - shift])."""
    def k(x_ref, o_ref):
        o_ref[...] = pltpu.roll(x_ref[...], 1, 1)

    x = jax.lax.broadcasted_iota(jnp.float32, (8, 128), 1)
    y = pl.pallas_call(
        k, out_shape=jax.ShapeDtypeStruct((8, 128), jnp.float32))(x)
    if bool(jnp.array_equal(y, jnp.roll(x, 1, axis=1))):
        return True
    if bool(jnp.array_equal(y, jnp.roll(x, -1, axis=1))):
        return False
    raise RuntimeError("Unexpected pltpu.roll behaviour")


def _roll_matches_numpy():
    global _ROLL_MATCHES_NUMPY
    if _ROLL_MATCHES_NUMPY is None:
        _ROLL_MATCHES_NUMPY = _probe_roll_convention()
    return _ROLL_MATCHES_NUMPY


# ---------------------------------------------------------------------------
# Kernel
# ---------------------------------------------------------------------------
def rdb_kernel(x_ref, w1_ref, w2_ref, w3_ref, wf_ref, o_ref,
               slab_ref, feat_ref, *, H, W, C_pad, g, roll_is_numpy):
    HW = H * W
    L = x_ref.shape[-1]                       # (B//num_blocks) * H * W lanes
    xv = x_ref[0]                             # (C_pad, L) f32, channels on sublanes

    # ---- hoisted per-tap boundary masks (computed exactly once) -----------
    pos = jax.lax.broadcasted_iota(jnp.int32, (1, L), 1)
    pim = pos % HW                            # per-image flattened position
    row = pim // W
    col = pim - row * W

    taps = [(dy, dx) for dy in (-1, 0, 1) for dx in (-1, 0, 1)]
    masks = []
    for dy, dx in taps:
        m = None
        if dy == -1:
            m = row >= 1
        elif dy == 1:
            m = row <= H - 2
        if dx == -1:
            m = (col >= 1) if m is None else m & (col >= 1)
        elif dx == 1:
            m = (col <= W - 2) if m is None else m & (col <= W - 2)
        masks.append(m)

    def roll_by(feat, d):
        # result[:, p] = feat[:, p + d]  (circular; wrap lanes masked out).
        if d == 0:
            return feat
        shift = (-d) % L if roll_is_numpy else d % L
        return pltpu.roll(feat, shift, 1)

    def write_slab(feat, row0):
        # Write the 9 masked, shifted copies of `feat` into the slab scratch
        # at static, sublane-aligned offsets (tap-major, channel-minor).
        cb = feat.shape[0]
        for t, ((dy, dx), m) in enumerate(zip(taps, masks)):
            r = roll_by(feat, dy * W + dx)
            slab_ref[row0 + t * cb:row0 + (t + 1) * cb, :] = (
                r if m is None else jnp.where(m, r, 0.0))

    nx = 9 * C_pad
    nd = 9 * g

    # Dense layer 1: one dot, K = 9*C_pad.
    write_slab(xv, 0)
    d1 = jnp.maximum(
        jnp.dot(w1_ref[...], slab_ref[0:nx, :],
                preferred_element_type=jnp.float32), 0.0)

    # Dense layer 2: reuse x's slab rows, append d1's; one dot, K = 9*(C_pad+g).
    write_slab(d1, nx)
    d2 = jnp.maximum(
        jnp.dot(w2_ref[...], slab_ref[0:nx + nd, :],
                preferred_element_type=jnp.float32), 0.0)

    # Dense layer 3: reuse x & d1 slabs, append d2's; K = 9*(C_pad+2g).
    write_slab(d2, nx + nd)
    d3 = jnp.maximum(
        jnp.dot(w3_ref[...], slab_ref[0:nx + 2 * nd, :],
                preferred_element_type=jnp.float32), 0.0)

    # Final 1x1 conv over concat(x, d1, d2, d3), residual folded into wf:
    # single merged dot over the stacked feature scratch.
    feat_ref[0:C_pad, :] = xv
    feat_ref[C_pad:C_pad + g, :] = d1
    feat_ref[C_pad + g:C_pad + 2 * g, :] = d2
    feat_ref[C_pad + 2 * g:, :] = d3
    o_ref[0] = jnp.dot(wf_ref[...], feat_ref[...],
                       preferred_element_type=jnp.float32)


# ---------------------------------------------------------------------------
# Factory wrapper: preps/packs weights once, returns a jitted forward fn.
# ---------------------------------------------------------------------------
def make_rdb_forward(w1, w2, w3, w1x1, *, num_blocks=1):
    """w1/w2/w3: HWIO 3x3 conv weights; w1x1: (C+3g, C). Returns fwd(x_nchw)."""
    C, g = w1.shape[2], w1.shape[3]
    C_pad = ((C + 7) // 8) * 8
    roll_is_numpy = _roll_matches_numpy()     # eager, one-time probe

    def pack(w, cin_pad=None):
        # (3,3,Cin,Cout) -> (Cout, 9*Cin[_pad]); column index = tap*Cin + c,
        # tap = kh*3 + kw, matching the in-kernel slab row order.
        if cin_pad is not None and cin_pad > w.shape[2]:
            w = jnp.pad(w, ((0, 0), (0, 0), (0, cin_pad - w.shape[2]), (0, 0)))
        return jnp.transpose(w, (3, 0, 1, 2)).reshape(w.shape[3], -1)

    w1p = pack(w1, C_pad).astype(jnp.float32)                       # (g, 9*C_pad)
    w2p = jnp.concatenate([pack(w2[:, :, :C, :], C_pad),
                           pack(w2[:, :, C:, :])], axis=1).astype(jnp.float32)
    w3p = jnp.concatenate([pack(w3[:, :, :C, :], C_pad),
                           pack(w3[:, :, C:C + g, :]),
                           pack(w3[:, :, C + g:, :])], axis=1).astype(jnp.float32)
    # 1x1 weights (Cout, Cin) with residual identity folded into the x block,
    # x columns padded to C_pad.
    wf_x = jnp.pad(w1x1[:C].T + jnp.eye(C, dtype=w1x1.dtype),
                   ((0, 0), (0, C_pad - C)))
    wf = jnp.concatenate([wf_x, w1x1[C:].T], axis=1).astype(jnp.float32)

    @jax.jit
    def fwd(x_nchw):
        B, Cin, H, W = x_nchw.shape
        assert Cin == C and B % num_blocks == 0
        imgs = B // num_blocks
        L = imgs * H * W

        # NCHW -> (num_blocks, C_pad, imgs*H*W): channels on sublanes (padded
        # to 8), batch folded into the lane axis.
        xp = jnp.pad(x_nchw.astype(jnp.float32),
                     ((0, 0), (0, C_pad - C), (0, 0), (0, 0)))
        xp = xp.reshape(num_blocks, imgs, C_pad, H * W)
        xp = jnp.transpose(xp, (0, 2, 1, 3)).reshape(num_blocks, C_pad, L)

        kernel = functools.partial(rdb_kernel, H=H, W=W, C_pad=C_pad, g=g,
                                   roll_is_numpy=roll_is_numpy)

        out = pl.pallas_call(
            kernel,
            out_shape=jax.ShapeDtypeStruct((num_blocks, C, L), jnp.float32),
            grid_spec=pltpu.PrefetchScalarGridSpec(
                num_scalar_prefetch=0,
                grid=(num_blocks,),
                in_specs=[
                    pl.BlockSpec((1, C_pad, L), lambda b: (b, 0, 0)),
                    pl.BlockSpec(w1p.shape, lambda b: (0, 0)),
                    pl.BlockSpec(w2p.shape, lambda b: (0, 0)),
                    pl.BlockSpec(w3p.shape, lambda b: (0, 0)),
                    pl.BlockSpec(wf.shape, lambda b: (0, 0)),
                ],
                out_specs=pl.BlockSpec((1, C, L), lambda b: (b, 0, 0)),
                scratch_shapes=[
                    pltpu.VMEM((9 * (C_pad + 2 * g), L), jnp.float32),  # tap slab
                    pltpu.VMEM((C_pad + 3 * g, L), jnp.float32),        # 1x1 stack
                ],
            ),
            compiler_params=pltpu.CompilerParams(
                dimension_semantics=("parallel",)),
        )(xp, w1p, w2p, w3p, wf)

        out = out.reshape(num_blocks, C, imgs, H * W)
        out = jnp.transpose(out, (0, 2, 1, 3)).reshape(B, C, H, W)
        return out

    return fwd


# ---------------------------------------------------------------------------
# Pure-JAX reference (mirrors the PyTorch RDB forward, is_batchnorm=False)
# ---------------------------------------------------------------------------
def rdb_reference(x_nchw, w1, w2, w3, w1x1):
    x = jnp.transpose(x_nchw, (0, 2, 3, 1)).astype(jnp.float32)

    def conv3x3(inp, w):
        return jax.lax.conv_general_dilated(
            inp, w, (1, 1), 'SAME',
            dimension_numbers=('NHWC', 'HWIO', 'NHWC'))

    d1 = jax.nn.relu(conv3x3(x, w1))
    c1 = jnp.concatenate([x, d1], axis=-1)
    d2 = jax.nn.relu(conv3x3(c1, w2))
    c2 = jnp.concatenate([c1, d2], axis=-1)
    d3 = jax.nn.relu(conv3x3(c2, w3))
    c3 = jnp.concatenate([c2, d3], axis=-1)
    out = jnp.einsum('nhwc,cd->nhwd', c3, w1x1) + x
    return jnp.transpose(out, (0, 3, 1, 2))


if __name__ == "__main__":
    # RDB(in_size=4, is_batchnorm=False, nDenselayer=3, growthRate=32)
    B, C, H, W = 2, 4, 16, 16
    g = 32

    key = jax.random.PRNGKey(0)
    kx, k1, k2, k3, k4 = jax.random.split(key, 5)

    x = jax.random.normal(kx, (B, C, H, W), jnp.float32)
    # Synthetic weights (HWIO for the 3x3 convs, (Cin, Cout) for the 1x1).
    w1 = jax.random.normal(k1, (3, 3, C, g), jnp.float32) * 0.05
    w2 = jax.random.normal(k2, (3, 3, C + g, g), jnp.float32) * 0.05
    w3 = jax.random.normal(k3, (3, 3, C + 2 * g, g), jnp.float32) * 0.05
    w1x1 = jax.random.normal(k4, (C + 3 * g, C), jnp.float32) * 0.05

    # num_blocks=1 folds the whole batch into lanes (best on v5e/v6e);
    # on v7x use num_blocks=2 so each TensorCore gets one parallel grid step.
    rdb_forward = make_rdb_forward(w1, w2, w3, w1x1, num_blocks=1)

    out = jax.block_until_ready(rdb_forward(x))
    ref = jax.block_until_ready(rdb_reference(x, w1, w2, w3, w1x1))

    assert out.shape == (B, C, H, W), out.shape
    assert jnp.allclose(out, ref, atol=1e-4, rtol=1e-4), \
        float(jnp.max(jnp.abs(out - ref)))
    print("KERNEL_OK")
</pallas_src>

<mosaic_0001>
module attributes {stable_mosaic.version = 11 : i64} {
  func.func @k(%arg0: memref<8x128xf32, #tpu.memory_space<vmem>>, %arg1: memref<8x128xf32, #tpu.memory_space<vmem>>) attributes {dimension_semantics = [], scalar_prefetch = 0 : i64, scratch_operands = 0 : i64, tpu.core_type = #tpu.core_type<tc>} {
    %c0 = arith.constant 0 : index
    %c0_0 = arith.constant 0 : index
    %0 = vector.load %arg0[%c0, %c0_0] : memref<8x128xf32, #tpu.memory_space<vmem>>, vector<8x128xf32>
    %c1_i32 = arith.constant 1 : i32
    %1 = tpu.dynamic_rotate %0 by %c1_i32 dim 1 : vector<8x128xf32>, i32 -> vector<8x128xf32>
    %c0_1 = arith.constant 0 : index
    %c0_2 = arith.constant 0 : index
    %2 = vector.load %arg1[%c0_1, %c0_2] : memref<8x128xf32, #tpu.memory_space<vmem>>, vector<8x128xf32>
    tpu.vector_store %arg1[%c0_1, %c0_2], %1 {strides = array<i32>} : memref<8x128xf32, #tpu.memory_space<vmem>>, vector<8x128xf32>,
    return
  }
}

</mosaic_0001>

<bundles_post_ra>
// kernel: tpu_custom_call.1
= control target key start
LH: loop header
LB: loop body
LE: loop exit
PB: predicated region body
PF: predicated region fallthrough
CT: control target
= control target key end

     0   :  { %6 = vsyncpa [#allocation3], 0  ;;  %s128_s0 = inlined_call_operand.hbm [shape: f32[8,128], index: 0, kind: input, shape index: {}]   ;;  %s129_s1 = inlined_call_operand.hbm [shape: f32[8,128], index: 1, kind: output, shape index: {}]  }
   0x1   :  { %7 = vsyncpa [#allocation4], 0  ;;  %s91_s6 = smov [#allocation2]   ;;  %s43_s10 = scalar_lea.hbm %s128_s0, 128 }
   0x2   :  { %s14_s7 = sshll.u32 %s91_s6, 4  ;;  %p44_p0 = scmp.ne.s32.totalorder %s128_s0, %s43_s10  ;;  %s15_s7 = int_to_ptr.vmem [resolvable:$true] %s14_s7 }
   0x3   :  { %p47_p1 = scmp.lt.u32.totalorder %s43_s10, %s128_s0 }
   0x5   :  { %p49_p2 = pnand %p47_p1, %p44_p0 }
   0x7   :  { %52 = shalt.err (!%p49_p2)
}
   0x8   :  { %s53_s15 = scalar_lea.vmem %s15_s7, 128  ;;  %p58_p4 = scmp.lt.s32.totalorder %s15_s7, %s15_s7 }
   0x9   :  { %p54_p3 = scmp.ne.s32.totalorder %s15_s7, %s53_s15  ;;  %p59_p5 = scmp.lt.s32.totalorder %s53_s15, %s53_s15 }
   0xb   :  { %p60_p6 = por %p59_p5, %p58_p4 }
   0xd   :  { %p61_p7 = pnand %p60_p6, %p54_p3 }
   0xf   :  { %64 = shalt.err (!%p61_p7)
}
  0x10   :  { %17 = dma.hbm_to_vmem [thread:$0]  %s128_s0, 128, %s15_s7, [#allocation3]  }
  0x11   :  { %87 = dma.done.wait [#allocation3], 128  }
  0x12   :  { %88 = vsyncadd [#allocation3], 4294967168  ;;  %v21_v0 = vld [vmem:[#allocation2] sm:$0xff]  ;;  %s92_s18 = smov 1   ;;  %s93_s19 = smov [#allocation5]  }
  0x13   :  { %22 = vrot.lane.b32.xlu0 %v21_v0, %s92_s18  ;;  %s31_s20 = sshll.u32 %s93_s19, 4  ;;  %s32_s20 = int_to_ptr.vmem [resolvable:$true] %s31_s20 }
  0x14   :  { %s65_s21 = scalar_lea.vmem %s32_s20, 128  ;;  %p70_p9 = scmp.lt.s32.totalorder %s32_s20, %s32_s20 }
  0x15   :  { %p66_p8 = scmp.ne.s32.totalorder %s32_s20, %s65_s21  ;;  %p71_p10 = scmp.lt.s32.totalorder %s65_s21, %s65_s21 }
  0x17   :  { %p72_p11 = por %p71_p10, %p70_p9 }
  0x19   :  { %p73_p12 = pnand %p72_p11, %p66_p8 }
  0x85   :  { %v23_v1 = vpop.permute.xlu0 %22 }
  0x86   :  { %24 = vst [vmem:[#allocation5] sm:$0xff] %v23_v1 }
  0x87   :  { %76 = shalt.err (!%p73_p12)
}
  0x88   :  { %s77_s0 = scalar_lea.hbm %s129_s1, 128 }
  0x89   :  { %p78_p13 = scmp.ne.s32.totalorder %s129_s1, %s77_s0  ;;  %p81_p0 = scmp.lt.u32.totalorder %s77_s0, %s129_s1 }
  0x8b   :  { %p83_p1 = pnand %p81_p0, %p78_p13 }
  0x8d   :  { %86 = shalt.err (!%p83_p1)
}
  0x8e   :  { %34 = dma.vmem_to_hbm [thread:$0]  %s32_s20, 128, %s129_s1, [#allocation4]  }
  0x8f   :  { %89 = dma.done.wait [#allocation4], 128  }
  0x90   :  { %90 = vsyncadd [#allocation4], 4294967168 }
  0x91   :  { %38 = vsyncpa [#allocation3], 1 }
  0x92   :  { %39 = vsyncpa [#allocation4], 1 }

</bundles_post_ra>
